<compile_context>
chip_gen: v5e
topology: v5e:2x2
jax: 0.10.0
libtpu: 0.0.40
codegen_flags: <defaults>
</compile_context>

<pallas_src>
import functools

import jax
import jax.numpy as jnp
from jax.experimental import pallas as pl
from jax.experimental.pallas import tpu as pltpu


# ----------------------------------------------------------------------------
# Sizing helpers (per TPU generation).
# ----------------------------------------------------------------------------
def _vmem_budget():
    """Return (vmem_limit_bytes, max_block_bytes) for this TPU generation."""
    try:
        cap = int(pltpu.get_tpu_info().vmem_capacity_bytes)
    except Exception:
        cap = 64 * 1024 * 1024  # conservative fallback (v7x-sized)
    vmem_limit = min(cap // 2, 64 * 1024 * 1024)       # 64 MiB v5e/v6e, 32 MiB v7x
    max_block_bytes = min(vmem_limit // 6, 8 * 1024 * 1024)
    return vmem_limit, max_block_bytes


def _sublane_multiple(dtype):
    return {4: 8, 2: 16, 1: 32}.get(jnp.dtype(dtype).itemsize, 8)


def _pick_blocks(nc, l, dtype, max_block_bytes):
    """Pick (row_block, lane_block, num_row_blocks, num_lane_blocks) for the
    (N*C, H*W) view.  Rows packed in sublane-tile multiples (or full dim),
    lanes a multiple of 128 (or the full, possibly odd, spatial extent).
    Budget uses 4 B/elem since kernels upcast to f32 internally."""
    sub = _sublane_multiple(dtype)
    bpe = 4
    if l <= 128 or (l % 128 != 0 and l * sub * bpe <= max_block_bytes):
        l_blk = l                                    # full (possibly odd) extent
    else:
        max_lanes = max(128, (max_block_bytes // (sub * bpe)) // 128 * 128)
        l_blk = min(max_lanes, max(128, (l // 128) * 128))
    rows_budget = max(sub, max_block_bytes // (l_blk * bpe))
    if nc <= rows_budget:
        r_blk = nc                                   # full dim: always legal
    else:
        r_blk = max(sub, (rows_budget // sub) * sub)
    return r_blk, l_blk, pl.cdiv(nc, r_blk), pl.cdiv(l, l_blk)


# ----------------------------------------------------------------------------
# Kernel 1: streaming per-row stats (sum, sum-of-squares) over (N*C, H*W).
# grid = (row_blocks [parallel], lane_blocks [arbitrary]); the outputs revisit
# the same (i, 0) block across the lane axis -> accumulator pattern.
# ----------------------------------------------------------------------------
def _stats_kernel(x_ref, sum_ref, sq_ref, *, mask_lanes, l_total, l_blk):
    j = pl.program_id(1)

    @pl.when(j == 0)
    def _init():
        sum_ref[...] = jnp.zeros_like(sum_ref)
        sq_ref[...] = jnp.zeros_like(sq_ref)

    x = x_ref[...].astype(jnp.float32)               # (r_blk, l_blk)
    if mask_lanes:                                   # ragged spatial tail
        lane = jax.lax.broadcasted_iota(jnp.int32, x.shape, 1)
        x = jnp.where(lane < (l_total - j * l_blk), x, 0.0)
    sum_ref[...] += jnp.sum(x, axis=1, keepdims=True)
    sq_ref[...] += jnp.sum(x * x, axis=1, keepdims=True)


def _row_stats(x_rows, vmem_limit, max_block_bytes):
    nc, l = x_rows.shape
    r_blk, l_blk, nr, nl = _pick_blocks(nc, l, x_rows.dtype, max_block_bytes)
    kernel = functools.partial(
        _stats_kernel, mask_lanes=(nl * l_blk != l), l_total=l, l_blk=l_blk)
    return pl.pallas_call(
        kernel,
        out_shape=(jax.ShapeDtypeStruct((nc, 1), jnp.float32),
                   jax.ShapeDtypeStruct((nc, 1), jnp.float32)),
        grid_spec=pltpu.PrefetchScalarGridSpec(
            num_scalar_prefetch=0,
            grid=(nr, nl),
            in_specs=[pl.BlockSpec((r_blk, l_blk), lambda i, j: (i, j))],
            out_specs=[pl.BlockSpec((r_blk, 1), lambda i, j: (i, 0)),
                       pl.BlockSpec((r_blk, 1), lambda i, j: (i, 0))],
        ),
        compiler_params=pltpu.CompilerParams(
            dimension_semantics=("parallel", "arbitrary"),
            vmem_limit_bytes=vmem_limit),
    )(x_rows)


def _init_params_streaming(x_nchw, scale=1.0):
    """Stats-only path for large tensors (no wasted normalize pass)."""
    n, c, h, w = x_nchw.shape
    nc, l = n * c, h * w
    vmem_limit, max_block_bytes = _vmem_budget()
    row_sum, row_sq = _row_stats(x_nchw.reshape(nc, l), vmem_limit,
                                 max_block_bytes)
    inv_count = 1.0 / float(n * l)
    ch_sum = jnp.sum(row_sum.reshape(n, c), axis=0)   # tiny (C,) glue in JAX
    ch_sq = jnp.sum(row_sq.reshape(n, c), axis=0)
    mean = ch_sum * inv_count
    # NOTE: streaming path uses E[x^2]-E[x]^2 with f32 accumulation (single
    # read of x).  The VMEM-resident path below uses the exact centered
    # two-pass formula of the PyTorch module.
    var = jnp.maximum(ch_sq * inv_count - mean * mean, 0.0)
    logs = jnp.log(float(scale) / (jnp.sqrt(var) + 1e-6))
    bias = -mean
    return bias.reshape(1, c, 1, 1), logs.reshape(1, c, 1, 1)


# ----------------------------------------------------------------------------
# Kernel 2: elementwise apply (forward or reverse), fully parallel grid.
# Per-row bias / exp(+-logs) are precomputed once in the wrapper.
# ----------------------------------------------------------------------------
def _apply_kernel(x_ref, b_ref, s_ref, o_ref, *, reverse):
    x = x_ref[...].astype(jnp.float32)
    if reverse:
        y = x * s_ref[...] - b_ref[...]              # x*exp(-logs) - bias
    else:
        y = (x + b_ref[...]) * s_ref[...]            # (x + bias)*exp(logs)
    o_ref[...] = y.astype(o_ref.dtype)


def actnorm2d_apply(x_nchw, bias, logs, reverse=False):
    n, c, h, w = x_nchw.shape
    nc, l = n * c, h * w
    x_rows = x_nchw.reshape(nc, l)                   # free reshape, native dtype
    vmem_limit, max_block_bytes = _vmem_budget()
    r_blk, l_blk, nr, nl = _pick_blocks(nc, l, x_rows.dtype, max_block_bytes)

    bias_c = jnp.asarray(bias, jnp.float32).reshape(c)
    logs_c = jnp.asarray(logs, jnp.float32).reshape(c)
    scale_c = jnp.exp(-logs_c) if reverse else jnp.exp(logs_c)
    b_rows = jnp.tile(bias_c, n).reshape(nc, 1)      # row r = n*C + c -> channel c
    s_rows = jnp.tile(scale_c, n).reshape(nc, 1)

    kernel = functools.partial(_apply_kernel, reverse=bool(reverse))
    y = pl.pallas_call(
        kernel,
        out_shape=jax.ShapeDtypeStruct((nc, l), x_rows.dtype),
        grid_spec=pltpu.PrefetchScalarGridSpec(
            num_scalar_prefetch=0,
            grid=(nr, nl),
            in_specs=[pl.BlockSpec((r_blk, l_blk), lambda i, j: (i, j)),
                      pl.BlockSpec((r_blk, 1), lambda i, j: (i, 0)),
                      pl.BlockSpec((r_blk, 1), lambda i, j: (i, 0))],
            out_specs=pl.BlockSpec((r_blk, l_blk), lambda i, j: (i, j)),
        ),
        compiler_params=pltpu.CompilerParams(
            dimension_semantics=("parallel", "parallel"),
            vmem_limit_bytes=vmem_limit),
    )(x_rows, b_rows, s_rows)
    return y.reshape(n, c, h, w)


# ----------------------------------------------------------------------------
# Kernel 3: VMEM-resident init (+ transform) for tensors that fit on chip.
# Single pass over HBM: read x once, exact centered stats, write y once.
# ----------------------------------------------------------------------------
def _init_resident_kernel(x_ref, y_ref, bias_ref, logs_ref, *, scale,
                          inv_count, n_batch, reverse):
    x = x_ref[...].astype(jnp.float32)               # (N, C, L)

    def fold(t):                                     # (N, C, 1) -> (C, 1)
        acc = t[0]
        for i in range(1, n_batch):                  # static, unrolled
            acc = acc + t[i]
        return acc

    mean = fold(jnp.sum(x, axis=2, keepdims=True)) * inv_count     # (C, 1)
    b = -mean
    xc = x + b                                       # broadcast over N and L
    var = fold(jnp.sum(xc * xc, axis=2, keepdims=True)) * inv_count
    logs = jnp.log(scale / (jnp.sqrt(var) + 1e-6))   # exact module math
    bias_ref[...] = b
    logs_ref[...] = logs
    if reverse:
        y_ref[...] = (x * jnp.exp(-logs) - b).astype(y_ref.dtype)
    else:
        y_ref[...] = (xc * jnp.exp(logs)).astype(y_ref.dtype)


def _init_forward_resident(x_nchw, scale, reverse):
    n, c, h, w = x_nchw.shape
    l = h * w
    x3 = x_nchw.reshape(n, c, l)                     # free reshape, native dtype
    vmem_limit, _ = _vmem_budget()
    kernel = functools.partial(_init_resident_kernel, scale=float(scale),
                               inv_count=1.0 / float(n * l),
                               n_batch=n, reverse=bool(reverse))
    y, bias, logs = pl.pallas_call(
        kernel,
        out_shape=(jax.ShapeDtypeStruct((n, c, l), x3.dtype),
                   jax.ShapeDtypeStruct((c, 1), jnp.float32),
                   jax.ShapeDtypeStruct((c, 1), jnp.float32)),
        grid_spec=pltpu.PrefetchScalarGridSpec(
            num_scalar_prefetch=0,
            grid=(1,),
            in_specs=[pl.BlockSpec((n, c, l), lambda i: (0, 0, 0))],
            out_specs=[pl.BlockSpec((n, c, l), lambda i: (0, 0, 0)),
                       pl.BlockSpec((c, 1), lambda i: (0, 0)),
                       pl.BlockSpec((c, 1), lambda i: (0, 0))],
        ),
        compiler_params=pltpu.CompilerParams(
            dimension_semantics=("arbitrary",),
            vmem_limit_bytes=vmem_limit),
    )(x3)
    return (y.reshape(n, c, h, w), bias.reshape(1, c, 1, 1),
            logs.reshape(1, c, 1, 1))


# ----------------------------------------------------------------------------
# Module-level wrapper mirroring _ActNorm.forward.  Parameter "storage"
# (bias/logs) is returned to the caller instead of being a module side effect.
# ----------------------------------------------------------------------------
def actnorm2d_forward(x, bias=None, logs=None, logdet=None, reverse=False,
                      scale=1.0):
    if x.ndim != 4:
        raise ValueError("_ActNorm expects a 4-D NCHW input")
    n, c, h, w = x.shape
    if bias is None or logs is None:
        # Not inited: data-dependent initialization from this batch.
        vmem_limit, _ = _vmem_budget()
        x_f32_bytes = n * c * h * w * 4
        if x_f32_bytes * 5 <= vmem_limit:
            # Whole tensor VMEM-resident: one read + one write, exact
            # centered-variance math.  (Small by construction -> single TC.)
            y, bias, logs = _init_forward_resident(x, scale, reverse)
        else:
            # Streaming: stats pass (both TCs) + parallel apply; no wasted
            # normalize pass when reverse=True.
            bias, logs = _init_params_streaming(x, scale)
            y = actnorm2d_apply(x, bias, logs, reverse=reverse)
    else:
        y = actnorm2d_apply(x, bias, logs, reverse=reverse)
    if logdet is not None:
        dlogdet = jnp.sum(jnp.asarray(logs, jnp.float32)) * (h * w)
        logdet = logdet + (-dlogdet if reverse else dlogdet)
    return y, logdet, bias, logs


if __name__ == "__main__":
    N, C, H, W = 2, 4, 16, 16
    key = jax.random.PRNGKey(0)
    x = 1.5 * jax.random.normal(key, (N, C, H, W), jnp.float32) + 0.3
    logdet0 = jnp.zeros((), jnp.float32)

    # Pure-JAX reference replicating the PyTorch module exactly.
    ref_bias = -jnp.mean(x, axis=(0, 2, 3), keepdims=True)
    ref_var = jnp.mean((x + ref_bias) ** 2, axis=(0, 2, 3), keepdims=True)
    ref_logs = jnp.log(1.0 / (jnp.sqrt(ref_var) + 1e-6))
    ref_y = (x + ref_bias) * jnp.exp(ref_logs)
    ref_logdet = logdet0 + jnp.sum(ref_logs) * (H * W)

    # 1) Not-inited training-mode forward (VMEM-resident init path) + logdet.
    y, logdet, bias, logs = actnorm2d_forward(x, logdet=logdet0)
    y = jax.block_until_ready(y)
    assert y.shape == x.shape
    assert jnp.allclose(y, ref_y, atol=1e-4, rtol=1e-4)
    assert jnp.allclose(bias, ref_bias, atol=1e-4, rtol=1e-4)
    assert jnp.allclose(logs, ref_logs, atol=1e-4, rtol=1e-4)
    assert jnp.allclose(logdet, ref_logdet, atol=1e-3, rtol=1e-4)

    # 2) Streaming stats kernel (the large-tensor init path), checked directly.
    s_bias, s_logs = _init_params_streaming(x, scale=1.0)
    s_bias = jax.block_until_ready(s_bias)
    assert jnp.allclose(s_bias, ref_bias, atol=1e-4, rtol=1e-4)
    assert jnp.allclose(s_logs, ref_logs, atol=1e-3, rtol=1e-3)

    # 3) Inited forward + reverse round-trip through the apply kernel.
    y2, _, _, _ = actnorm2d_forward(x, bias=bias, logs=logs)
    xr, _, _, _ = actnorm2d_forward(y2, bias=bias, logs=logs, reverse=True)
    xr = jax.block_until_ready(xr)
    assert jnp.allclose(y2, ref_y, atol=1e-4, rtol=1e-4)
    assert jnp.allclose(xr, x, atol=1e-4, rtol=1e-4)

    # 4) Native-dtype (bf16) apply: no f32 copy of x is materialized in HBM.
    y_bf16, _, _, _ = actnorm2d_forward(x.astype(jnp.bfloat16), bias=bias,
                                        logs=logs)
    y_bf16 = jax.block_until_ready(y_bf16)
    assert y_bf16.dtype == jnp.bfloat16
    assert jnp.allclose(y_bf16.astype(jnp.float32), ref_y, atol=1e-1, rtol=1e-1)

    print("KERNEL_OK")
</pallas_src>

<mosaic_0001>
module attributes {stable_mosaic.version = 11 : i64} {
  func.func @_init_resident_kernel(%arg0: i32, %arg1: memref<2x4x256xf32, #tpu.memory_space<vmem>>, %arg2: memref<2x4x256xf32, #tpu.memory_space<vmem>>, %arg3: memref<4x1xf32, #tpu.memory_space<vmem>>, %arg4: memref<4x1xf32, #tpu.memory_space<vmem>>) attributes {dimension_semantics = [#tpu.dimension_semantics<arbitrary>], iteration_bounds = array<i64: 1>, scalar_prefetch = 0 : i64, scratch_operands = 0 : i64, tpu.core_type = #tpu.core_type<tc>, window_params = [{pipeline_mode = #tpu.pipeline_mode<synchronous>, transform_indices = @transform_0, window_bounds = array<i64: 2, 4, 256>}, {pipeline_mode = #tpu.pipeline_mode<synchronous>, transform_indices = @transform_1, window_bounds = array<i64: 2, 4, 256>}, {pipeline_mode = #tpu.pipeline_mode<synchronous>, transform_indices = @transform_2, window_bounds = array<i64: 4, 1>}, {pipeline_mode = #tpu.pipeline_mode<synchronous>, transform_indices = @transform_3, window_bounds = array<i64: 4, 1>}]} {
    %c0 = arith.constant 0 : index
    %c0_0 = arith.constant 0 : index
    %c0_1 = arith.constant 0 : index
    %0 = vector.load %arg1[%c0, %c0_0, %c0_1] : memref<2x4x256xf32, #tpu.memory_space<vmem>>, vector<2x4x256xf32>
    %cst = arith.constant dense<0.000000e+00> : vector<2x4xf32>
    %1 = vector.multi_reduction <add>, %0, %cst [2] : vector<2x4x256xf32> to vector<2x4xf32>
    %2 = vector.shape_cast %1 : vector<2x4xf32> to vector<2x4x1xf32>
    %3 = vector.extract_strided_slice %2 {offsets = [0, 0, 0], sizes = [1, 4, 1], strides = [1, 1, 1]} : vector<2x4x1xf32> to vector<1x4x1xf32>
    %4 = vector.shape_cast %3 : vector<1x4x1xf32> to vector<4x1xf32>
    %5 = vector.extract_strided_slice %2 {offsets = [1, 0, 0], sizes = [1, 4, 1], strides = [1, 1, 1]} : vector<2x4x1xf32> to vector<1x4x1xf32>
    %6 = vector.shape_cast %5 : vector<1x4x1xf32> to vector<4x1xf32>
    %7 = arith.addf %4, %6 : vector<4x1xf32>
    %cst_2 = arith.constant 0.001953125 : f32
    %8 = vector.broadcast %cst_2 : f32 to vector<4x1xf32>
    %9 = arith.mulf %7, %8 : vector<4x1xf32>
    %cst_3 = arith.constant 0.000000e+00 : f32
    %10 = vector.broadcast %cst_3 : f32 to vector<4x1xf32>
    %11 = arith.subf %10, %9 : vector<4x1xf32>
    %12 = vector.shape_cast %11 : vector<4x1xf32> to vector<1x4x1xf32>
    %13 = vector.broadcast %12 : vector<1x4x1xf32> to vector<2x4x256xf32>
    %14 = arith.addf %0, %13 : vector<2x4x256xf32>
    %15 = arith.mulf %14, %14 : vector<2x4x256xf32>
    %cst_4 = arith.constant dense<0.000000e+00> : vector<2x4xf32>
    %16 = vector.multi_reduction <add>, %15, %cst_4 [2] : vector<2x4x256xf32> to vector<2x4xf32>
    %17 = vector.shape_cast %16 : vector<2x4xf32> to vector<2x4x1xf32>
    %18 = vector.extract_strided_slice %17 {offsets = [0, 0, 0], sizes = [1, 4, 1], strides = [1, 1, 1]} : vector<2x4x1xf32> to vector<1x4x1xf32>
    %19 = vector.shape_cast %18 : vector<1x4x1xf32> to vector<4x1xf32>
    %20 = vector.extract_strided_slice %17 {offsets = [1, 0, 0], sizes = [1, 4, 1], strides = [1, 1, 1]} : vector<2x4x1xf32> to vector<1x4x1xf32>
    %21 = vector.shape_cast %20 : vector<1x4x1xf32> to vector<4x1xf32>
    %22 = arith.addf %19, %21 : vector<4x1xf32>
    %cst_5 = arith.constant 0.001953125 : f32
    %23 = vector.broadcast %cst_5 : f32 to vector<4x1xf32>
    %24 = arith.mulf %22, %23 : vector<4x1xf32>
    %25 = math.sqrt %24 : vector<4x1xf32>
    %cst_6 = arith.constant 9.99999997E-7 : f32
    %26 = vector.broadcast %cst_6 : f32 to vector<4x1xf32>
    %27 = arith.addf %25, %26 : vector<4x1xf32>
    %cst_7 = arith.constant 1.000000e+00 : f32
    %28 = vector.broadcast %cst_7 : f32 to vector<4x1xf32>
    %29 = arith.divf %28, %27 : vector<4x1xf32>
    %30 = math.log %29 : vector<4x1xf32>
    %c0_8 = arith.constant 0 : index
    %c0_9 = arith.constant 0 : index
    %31 = vector.load %arg3[%c0_8, %c0_9] : memref<4x1xf32, #tpu.memory_space<vmem>>, vector<4x1xf32>
    tpu.vector_store %arg3[%c0_8, %c0_9], %11 {strides = array<i32>} : memref<4x1xf32, #tpu.memory_space<vmem>>, vector<4x1xf32>,
    %c0_10 = arith.constant 0 : index
    %c0_11 = arith.constant 0 : index
    %32 = vector.load %arg4[%c0_10, %c0_11] : memref<4x1xf32, #tpu.memory_space<vmem>>, vector<4x1xf32>
    tpu.vector_store %arg4[%c0_10, %c0_11], %30 {strides = array<i32>} : memref<4x1xf32, #tpu.memory_space<vmem>>, vector<4x1xf32>,
    %33 = math.exp %30 : vector<4x1xf32>
    %34 = vector.shape_cast %33 : vector<4x1xf32> to vector<1x4x1xf32>
    %35 = vector.broadcast %34 : vector<1x4x1xf32> to vector<2x4x256xf32>
    %36 = arith.mulf %14, %35 : vector<2x4x256xf32>
    %c0_12 = arith.constant 0 : index
    %c0_13 = arith.constant 0 : index
    %c0_14 = arith.constant 0 : index
    %37 = vector.load %arg2[%c0_12, %c0_13, %c0_14] : memref<2x4x256xf32, #tpu.memory_space<vmem>>, vector<2x4x256xf32>
    tpu.vector_store %arg2[%c0_12, %c0_13, %c0_14], %36 {strides = array<i32>} : memref<2x4x256xf32, #tpu.memory_space<vmem>>, vector<2x4x256xf32>,
    return
  }
  func.func @transform_0(%arg0: i32) -> (i32, i32, i32) {
    %c0_i32 = arith.constant 0 : i32
    %c0_i32_0 = arith.constant 0 : i32
    %c0_i32_1 = arith.constant 0 : i32
    %c0_i32_2 = arith.constant 0 : i32
    return %c0_i32, %c0_i32_0, %c0_i32_1 : i32, i32, i32
  }
  func.func @transform_1(%arg0: i32) -> (i32, i32, i32) {
    %c0_i32 = arith.constant 0 : i32
    %c0_i32_0 = arith.constant 0 : i32
    %c0_i32_1 = arith.constant 0 : i32
    %c0_i32_2 = arith.constant 0 : i32
    return %c0_i32, %c0_i32_0, %c0_i32_1 : i32, i32, i32
  }
  func.func @transform_2(%arg0: i32) -> (i32, i32) {
    %c0_i32 = arith.constant 0 : i32
    %c0_i32_0 = arith.constant 0 : i32
    %c0_i32_1 = arith.constant 0 : i32
    return %c0_i32, %c0_i32_0 : i32, i32
  }
  func.func @transform_3(%arg0: i32) -> (i32, i32) {
    %c0_i32 = arith.constant 0 : i32
    %c0_i32_0 = arith.constant 0 : i32
    %c0_i32_1 = arith.constant 0 : i32
    return %c0_i32, %c0_i32_0 : i32, i32
  }
}

</mosaic_0001>

<bundles_post_ra>
// kernel: tpu_custom_call.1
= control target key start
LH: loop header
LB: loop body
LE: loop exit
PB: predicated region body
PF: predicated region fallthrough
CT: control target
= control target key end

     0   :  { %9 = vsyncpa [#allocation3], 0  ;;  %s289_s0 = inlined_call_operand.hbm [shape: f32[2,4,256], index: 0, kind: input, shape index: {}]   ;;  %s290_s1 = inlined_call_operand.hbm [shape: f32[2,4,256], index: 1, kind: output, shape index: {0}]   ;;  %s291_s2 = inlined_call_operand.vmem [shape: f32[4,1], index: 2, kind: output, shape index: {1}]   ;;  %s292_s3 = inlined_call_operand.vmem [shape: f32[4,1], index: 3, kind: output, shape index: {2}]  }
   0x1   :  { %10 = vsyncpa [#allocation4], 0  ;;  %s15_s14 = sshll.u32 %s289_s0, 4  ;;  %s229_s15 = smov [#allocation2]   ;;  %s16_s14 = int_to_ptr.hbm [resolvable:$true] %s15_s14 }
   0x2   :  { %s17_s16 = sshll.u32 %s229_s15, 4  ;;  %s230_s17 = smov 128   ;;  %s18_s16 = int_to_ptr.vmem [resolvable:$true] %s17_s16 }
   0x3   :  { %s231_s18 = smov 8  }
   0x4   :  { %23 = dma.hbm_to_vmem [thread:$0]  %s16_s14, 256, %s18_s16, [#allocation3], %s230_s17, %s230_s17, %s231_s18  }
   0x5   :  { %225 = dma.done.wait [#allocation3], 256  }
   0x6   :  { %226 = vsyncadd [#allocation3], 4294967040  ;;  %v28_v0 = vld [vmem:[#allocation2] sm:$0xff]  ;;  %v29_v1 = vld [vmem:[#allocation2 + $0x8] sm:$0xff]  ;;  %vm43_vm0 = vcmask 1043456   ;;  %vm122_vm1 = vcmask 3072  }
   0x7   :  { %32 = vst [vmem:[#allocation1] ss:$2 sm:$0xff] %v28_v0  ;;  %v232_v13 = vmov 839922192   ;;  %s233_s21 = smov [#allocation5]   ;;  %s143_s25 = sshll.u32 %s290_s1, 4  ;;  %s144_s25 = int_to_ptr.hbm [resolvable:$true] %s143_s25 }
   0x8   :  { %36 = vst [vmem:[#allocation1 + $0x10] ss:$2 sm:$0xff] %v29_v1  ;;  %v264_v14 = vunpack.c.l.s4 %v232_v13  ;;  %s141_s22 = sshll.u32 %s233_s21, 4  ;;  %s142_s22 = int_to_ptr.vmem [resolvable:$true] %s141_s22 }
   0xa   :  { %v60_v17 = vunpack.c.0.s8 %v264_v14 }
   0xe   :  { %v33_v2 = vld.sshfl [vmem:[#allocation1] sm:$0xff pattern:$0x75316420]  ;;  %v34_v3 = vld.sshfl [vmem:[#allocation1 + $0x8] sm:$0xff pattern:$0x75316420] }
   0xf   :  { %v44_v4 = vsel %vm43_vm0, %v33_v2, 0.0  ;;  %v45_v5 = vsel %vm43_vm0, %v34_v3, 0.0  ;;  %v37_v7 = vld.sshfl [vmem:[#allocation1 + $0x10] sm:$0xff pattern:$0x75316420] }
  0x10   :  { %v46_v6 = vadd.f32 %v45_v5, %v44_v4  ;;  %v38_v8 = vld.sshfl [vmem:[#allocation1 + $0x18] sm:$0xff pattern:$0x75316420]  ;;  %v49_v9 = vsel %vm43_vm0, %v37_v7, 0.0 }
  0x11   :  { %v50_v10 = vsel %vm43_vm0, %v38_v8, 0.0 }
  0x12   :  { %47 = vadd.xlane.f32.xlu0 %v46_v6  ;;  %v51_v11 = vadd.f32 %v50_v10, %v49_v9 }
  0x1a   :  { %52 = vadd.xlane.f32.xlu0 %v51_v11 }
  0x85   :  { %v48_v12 = vpop.xlane.xlu0 %47 }
  0x8d   :  { %v53_v15 = vpop.xlane.xlu0 %52 }
  0x8e   :  { %v54_v16 = vadd.f32 %v53_v15, %v48_v12 }
  0x90   :  { %v55_v18 = vmul.f32 0.001953125, %v54_v16 }
  0x92   :  { %v56_v19 = vsub.f32 0.0, %v55_v18 }
  0x94   :  { %v61_v20 = vperm.slane %v56_v19, %v60_v17  ;;  %123 = vst.msk [vmem:[%s291_s2] sm:$0xf] %vm122_vm1, %v56_v19 }
  0x96   :  { %v63_v21 = vadd.f32 %v61_v20, %v28_v0  ;;  %v64_v22 = vadd.f32 %v61_v20, %v29_v1 }
  0x98   :  { %v65_v23 = vmul.f32 %v63_v21, %v63_v21  ;;  %v66_v24 = vmul.f32 %v64_v22, %v64_v22 }
  0x9a   :  { %69 = vst [vmem:[#allocation1] ss:$2 sm:$0xff] %v65_v23 }
  0x9b   :  { %73 = vst [vmem:[#allocation1 + $0x10] ss:$2 sm:$0xff] %v66_v24 }
  0xa1   :  { %v70_v25 = vld.sshfl [vmem:[#allocation1] sm:$0xff pattern:$0x75316420]  ;;  %v71_v26 = vld.sshfl [vmem:[#allocation1 + $0x8] sm:$0xff pattern:$0x75316420] }
  0xa2   :  { %v80_v27 = vsel %vm43_vm0, %v70_v25, 0.0  ;;  %v81_v28 = vsel %vm43_vm0, %v71_v26, 0.0  ;;  %v74_v30 = vld.sshfl [vmem:[#allocation1 + $0x10] sm:$0xff pattern:$0x75316420] }
  0xa3   :  { %v82_v29 = vadd.f32 %v81_v28, %v80_v27  ;;  %v75_v31 = vld.sshfl [vmem:[#allocation1 + $0x18] sm:$0xff pattern:$0x75316420]  ;;  %v85_v32 = vsel %vm43_vm0, %v74_v30, 0.0 }
  0xa4   :  { %v86_v33 = vsel %vm43_vm0, %v75_v31, 0.0 }
  0xa5   :  { %83 = vadd.xlane.f32.xlu1 %v82_v29  ;;  %v87_v34 = vadd.f32 %v86_v33, %v85_v32 }
  0xad   :  { %88 = vadd.xlane.f32.xlu1 %v87_v34 }
 0x118   :  { %v84_v35 = vpop.xlane.xlu1 %83 }
 0x120   :  { %v89_v36 = vpop.xlane.xlu1 %88 }
 0x121   :  { %v90_v37 = vadd.f32 %v89_v36, %v84_v35 }
 0x123   :  { %v91_v38 = vmul.f32 0.001953125, %v90_v37 }
 0x125   :  { %169 = vrsqrt.f32 %v91_v38  ;;  %vm99_vm2 = vcmp.eq.f32.partialorder %v91_v38, inf  ;;  %v102_v46 = vand.u32 2147483648, %v91_v38  ;;  %vm101_vm3 = vcmp.eq.f32.partialorder %v91_v38, 0.0 }
 0x12b   :  { %v170_v39 = vpop.eup %169 }
 0x12c   :  { %v93_v40 = vmul.f32 %v170_v39, %v91_v38 }
 0x12e   :  { %v94_v41 = vmul.f32 %v170_v39, %v93_v40 }
 0x130   :  { %v95_v42 = vmul.f32 0.5, %v94_v41 }
 0x132   :  { %v96_v43 = vsub.f32 1.5, %v95_v42 }
 0x134   :  { %v97_v44 = vmul.f32 %v170_v39, %v96_v43 }
 0x136   :  { %v98_v45 = vmul.f32 %v97_v44, %v91_v38 }
 0x138   :  { %v100_v47 = vsel %vm99_vm2, %v91_v38, %v98_v45 }
 0x139   :  { %v103_v48 = vsel %vm101_vm3, %v102_v46, %v100_v47 }
 0x13a   :  { %v104_v49 = vadd.f32 1e-06, %v103_v48 }
 0x13c   :  { %171 = vrcp.f32 %v104_v49  ;;  %v116_v53 = vand.u32 2147483648, %v104_v49  ;;  %v114_v55 = vand.u32 2147483647, %v104_v49  ;;  %vm110_vm5 = vweird.f32 %v104_v49 }
 0x13e   :  { %v117_v57 = vor.u32 1.1754944e-38, %v116_v53  ;;  %vm115_vm7 = vcmp.eq.f32.partialorder %v114_v55, 8.507059e+37 }
 0x142   :  { %v172_v50 = vpop.eup %171 }
 0x143   :  { %v106_v51 = vmul.f32 %v172_v50, %v104_v49  ;;  %vm111_vm4 = vweird.f32 %v172_v50 }
 0x144   :  { %vm112_vm6 = vmor %vm110_vm5, %vm111_vm4 }
 0x145   :  { %v107_v52 = vsub.f32 1.0, %v106_v51 }
 0x147   :  { %v108_v54 = vmul.f32 %v172_v50, %v107_v52 }
 0x149   :  { %v109_v56 = vadd.f32 %v172_v50, %v108_v54 }
 0x14b   :  { %v113_v58 = vsel %vm112_vm6, %v172_v50, %v109_v56 }
 0x14c   :  { %v118_v59 = vsel %vm115_vm7, %v117_v57, %v113_v58 }
 0x14d   :  { %173 = vlog2.f32 %v118_v59 }
 0x153   :  { %v174_v60 = vpop.eup %173 }
 0x154   :  { %v121_v61 = vmul.f32 0.6931472, %v174_v60 }
 0x156   :  { %124 = vst.msk [vmem:[%s292_s3] sm:$0xf] %vm122_vm1, %v121_v61  ;;  %v125_v62 = vmul.f32 1.442695, %v121_v61 }
 0x158   :  { %175 = vpow2.f32 %v125_v62 }
 0x15e   :  { %v176_v63 = vpop.eup %175 }
 0x15f   :  { %v131_v0 = vperm.slane %v176_v63, %v60_v17 }
 0x161   :  { %v133_v1 = vmul.f32 %v131_v0, %v63_v21  ;;  %v134_v2 = vmul.f32 %v131_v0, %v64_v22 }
 0x163   :  { %135 = vst [vmem:[#allocation5] sm:$0xff] %v133_v1 }
 0x164   :  { %136 = vst [vmem:[#allocation5 + $0x8] sm:$0xff] %v134_v2 }
 0x165   :  { %149 = dma.vmem_to_hbm [thread:$0]  %s142_s22, 256, %s144_s25, [#allocation4], %s230_s17, %s230_s17, %s231_s18  }
 0x166   :  { %227 = dma.done.wait [#allocation4], 256  }
 0x167   :  { %228 = vsyncadd [#allocation4], 4294967040 }
 0x168   :  { %162 = vsyncpa [#allocation3], 1 }
 0x169   :  { %163 = vsyncpa [#allocation4], 1 }

</bundles_post_ra>
